<compile_context>
chip_gen: v6e
topology: v6e:2x2x1
jax: 0.10.0
libtpu: 0.0.40
codegen_flags: <defaults>
</compile_context>

<pallas_src>
import math
import jax
import jax.numpy as jnp
from jax.experimental import pallas as pl
from jax.experimental.pallas import tpu as pltpu


def _round_up(x, m):
    return ((x + m - 1) // m) * m


def _ffn_kernel(x_ref, w1_ref, b1_ref, w2_ref, b2_ref, o_ref, acc_ref):
    # x_ref:  (TM, d_model) bf16        w1_ref: (d_model, Tff) bf16
    # b1_ref: (1, Tff) f32              w2_ref: (Tff, d_model) bf16
    # b2_ref: (1, d_model) f32          o_ref:  (TM, d_model) out dtype
    # acc_ref: (TM, d_model) f32 accumulator over the d_ff grid axis.
    k = pl.program_id(1)

    @pl.when(k == 0)
    def _init():
        acc_ref[...] = jnp.zeros_like(acc_ref)

    # First matmul on the MXU (bf16 in, f32 accumulate); bias add in f32.
    h = jnp.dot(x_ref[...], w1_ref[...], preferred_element_type=jnp.float32)
    h = h + b1_ref[...]
    # Exact (erf) GELU in f32 — matches nn.GELU() default.
    g = 0.5 * h * (1.0 + jax.lax.erf(h * (1.0 / math.sqrt(2.0))))
    # TODO(synk): dropout is identity in eval mode; training-mode dropout
    # (pltpu.prng_random_bits mask) is not implemented here.
    acc_ref[...] += jnp.dot(g.astype(w2_ref.dtype), w2_ref[...],
                            preferred_element_type=jnp.float32)

    @pl.when(k == pl.num_programs(1) - 1)
    def _finalize():
        o_ref[...] = (acc_ref[...] + b2_ref[...]).astype(o_ref.dtype)


def feed_forward_block_2d(x, w1, b1, w2, b2, *, tile_m=256, tile_ff=512):
    """x: (B, H, W, d_model). Weights stored (in, out): w1 (d_model, d_ff),
    w2 (d_ff, d_model). Returns (B, H, W, d_model) in x.dtype."""
    B, H, W, d_model = x.shape
    d_ff = w1.shape[1]
    N = B * H * W
    out_dtype = x.dtype

    # Row tiling: clamp the tile for tiny inputs, pad N up to a tile multiple
    # (second-to-last block dim must stay a multiple of 8).
    tile_m = min(tile_m, _round_up(N, 8))
    n_pad = _round_up(N, tile_m)
    # d_ff reduction tiling: clamp to d_ff (lane-aligned) and zero-pad.
    tile_ff = min(tile_ff, _round_up(d_ff, 128))
    ff_pad = _round_up(d_ff, tile_ff)

    x2d = x.reshape(N, d_model)
    if n_pad != N:
        x2d = jnp.pad(x2d, ((0, n_pad - N), (0, 0)))
    if ff_pad != d_ff:
        w1 = jnp.pad(w1, ((0, 0), (0, ff_pad - d_ff)))
        b1 = jnp.pad(b1, ((0, ff_pad - d_ff),))
        w2 = jnp.pad(w2, ((0, ff_pad - d_ff), (0, 0)))

    # bf16 MXU inputs, f32 accumulation; biases / GELU stay in f32.
    x2d = x2d.astype(jnp.bfloat16)
    w1 = w1.astype(jnp.bfloat16)
    w2 = w2.astype(jnp.bfloat16)
    b1_2d = b1.reshape(1, ff_pad).astype(jnp.float32)
    b2_2d = b2.reshape(1, d_model).astype(jnp.float32)

    grid = (n_pad // tile_m, ff_pad // tile_ff)

    cost = pl.CostEstimate(
        flops=4 * N * d_model * d_ff,
        transcendentals=N * d_ff,
        bytes_accessed=(x2d.size * 2 + w1.size * 2 + w2.size * 2
                        + b1_2d.size * 4 + b2_2d.size * 4
                        + n_pad * d_model * jnp.dtype(out_dtype).itemsize),
    )

    out2d = pl.pallas_call(
        _ffn_kernel,
        out_shape=jax.ShapeDtypeStruct((n_pad, d_model), out_dtype),
        grid_spec=pltpu.PrefetchScalarGridSpec(
            num_scalar_prefetch=0,
            grid=grid,
            in_specs=[
                pl.BlockSpec((tile_m, d_model), lambda i, k: (i, 0)),   # x rows (k-resident)
                pl.BlockSpec((d_model, tile_ff), lambda i, k: (0, k)),  # W1 tile
                pl.BlockSpec((1, tile_ff), lambda i, k: (0, k)),        # b1 tile
                pl.BlockSpec((tile_ff, d_model), lambda i, k: (k, 0)),  # W2 tile
                pl.BlockSpec((1, d_model), lambda i, k: (0, 0)),        # b2
            ],
            out_specs=pl.BlockSpec((tile_m, d_model), lambda i, k: (i, 0)),
            scratch_shapes=[pltpu.VMEM((tile_m, d_model), jnp.float32)],
        ),
        compiler_params=pltpu.CompilerParams(
            dimension_semantics=("parallel", "arbitrary"),
            vmem_limit_bytes=48 * 1024 * 1024),
        cost_estimate=cost,
    )(x2d, w1, b1_2d, w2, b2_2d)

    return out2d[:N].astype(out_dtype).reshape(B, H, W, d_model)


def init_params(key, d_model, d_ff):
    """Deterministic init mimicking nn.Linear defaults (uniform ±1/sqrt(fan_in)).
    Weights stored already transposed to (in, out) so the kernel does x @ W."""
    k1, k2, k3, k4 = jax.random.split(key, 4)
    bound1 = 1.0 / math.sqrt(d_model)
    bound2 = 1.0 / math.sqrt(d_ff)
    w1 = jax.random.uniform(k1, (d_model, d_ff), jnp.float32, -bound1, bound1)
    b1 = jax.random.uniform(k2, (d_ff,), jnp.float32, -bound1, bound1)
    w2 = jax.random.uniform(k3, (d_ff, d_model), jnp.float32, -bound2, bound2)
    b2 = jax.random.uniform(k4, (d_model,), jnp.float32, -bound2, bound2)
    return w1, b1, w2, b2


def _reference(x, w1, b1, w2, b2):
    h = jnp.einsum("bhwc,cf->bhwf", x, w1) + b1
    g = 0.5 * h * (1.0 + jax.lax.erf(h / math.sqrt(2.0)))
    return jnp.einsum("bhwf,fc->bhwc", g, w2) + b2


if __name__ == "__main__":
    B, H, W = 2, 4, 2
    d_model, d_ff = 128, 256
    dropout = 0.1  # identity at inference

    key = jax.random.PRNGKey(0)
    kx, kp = jax.random.split(key)
    x = jax.random.normal(kx, (B, H, W, d_model), jnp.float32)
    w1, b1, w2, b2 = init_params(kp, d_model, d_ff)

    y = feed_forward_block_2d(x, w1, b1, w2, b2)
    y = jax.block_until_ready(y)

    y_ref = _reference(x, w1, b1, w2, b2)
    assert y.shape == (B, H, W, d_model)
    # bf16 MXU inputs vs f32 reference -> loosened tolerance.
    max_err = float(jnp.max(jnp.abs(y - y_ref)))
    assert jnp.allclose(y, y_ref, rtol=2e-2, atol=2e-2), (
        f"mismatch vs reference, max abs err {max_err}")

    print("KERNEL_OK")
</pallas_src>

<mosaic_0001>
module attributes {stable_mosaic.version = 11 : i64} {
  func.func @_ffn_kernel(%arg0: i32, %arg1: i32, %arg2: memref<16x128xbf16, #tpu.memory_space<vmem>>, %arg3: memref<128x256xbf16, #tpu.memory_space<vmem>>, %arg4: memref<1x256xf32, #tpu.memory_space<vmem>>, %arg5: memref<256x128xbf16, #tpu.memory_space<vmem>>, %arg6: memref<1x128xf32, #tpu.memory_space<vmem>>, %arg7: memref<16x128xf32, #tpu.memory_space<vmem>>, %arg8: memref<16x128xf32, #tpu.memory_space<vmem>>) attributes {dimension_semantics = [#tpu.dimension_semantics<parallel>, #tpu.dimension_semantics<arbitrary>], iteration_bounds = array<i64: 1, 1>, scalar_prefetch = 0 : i64, scratch_operands = 1 : i64, tpu.core_type = #tpu.core_type<tc>, window_params = [{transform_indices = @transform_0, window_bounds = array<i64: 16, 128>}, {transform_indices = @transform_1, window_bounds = array<i64: 128, 256>}, {transform_indices = @transform_2, window_bounds = array<i64: 1, 256>}, {transform_indices = @transform_3, window_bounds = array<i64: 256, 128>}, {pipeline_mode = #tpu.pipeline_mode<synchronous>, transform_indices = @transform_4, window_bounds = array<i64: 1, 128>}, {transform_indices = @transform_5, window_bounds = array<i64: 16, 128>}]} {
    %c0_i32 = arith.constant 0 : i32
    %0 = arith.cmpi eq, %arg1, %c0_i32 : i32
    %1 = arith.extui %0 : i1 to i32
    %c0_i32_0 = arith.constant 0 : i32
    %2 = arith.cmpi ne, %1, %c0_i32_0 : i32
    scf.if %2 {
      %cst_18 = arith.constant 0.000000e+00 : f32
      %26 = vector.broadcast %cst_18 : f32 to vector<16x128xf32>
      %c0_19 = arith.constant 0 : index
      %c0_20 = arith.constant 0 : index
      %27 = vector.load %arg8[%c0_19, %c0_20] : memref<16x128xf32, #tpu.memory_space<vmem>>, vector<16x128xf32>
      tpu.vector_store %arg8[%c0_19, %c0_20], %26 {strides = array<i32>} : memref<16x128xf32, #tpu.memory_space<vmem>>, vector<16x128xf32>,
    } else {
    }
    %c0 = arith.constant 0 : index
    %c0_1 = arith.constant 0 : index
    %3 = vector.load %arg2[%c0, %c0_1] : memref<16x128xbf16, #tpu.memory_space<vmem>>, vector<16x128xbf16>
    %c0_2 = arith.constant 0 : index
    %c0_3 = arith.constant 0 : index
    %4 = vector.load %arg3[%c0_2, %c0_3] : memref<128x256xbf16, #tpu.memory_space<vmem>>, vector<128x256xbf16>
    %cst = arith.constant dense<0.000000e+00> : vector<16x256xf32>
    %5 = tpu.matmul %3, %4, %cst {dimension_numbers = #tpu.dot_dimension_numbers<[1], [0], [0], [1], [0, 0, 1, 1], [], []>} : vector<16x128xbf16>, vector<128x256xbf16>, vector<16x256xf32> -> vector<16x256xf32>
    %c0_4 = arith.constant 0 : index
    %c0_5 = arith.constant 0 : index
    %6 = vector.load %arg4[%c0_4, %c0_5] : memref<1x256xf32, #tpu.memory_space<vmem>>, vector<1x256xf32>
    %7 = vector.broadcast %6 : vector<1x256xf32> to vector<16x256xf32>
    %8 = arith.addf %5, %7 : vector<16x256xf32>
    %cst_6 = arith.constant 5.000000e-01 : f32
    %9 = vector.broadcast %cst_6 : f32 to vector<16x256xf32>
    %10 = arith.mulf %9, %8 : vector<16x256xf32>
    %cst_7 = arith.constant 0.707106769 : f32
    %11 = vector.broadcast %cst_7 : f32 to vector<16x256xf32>
    %12 = arith.mulf %8, %11 : vector<16x256xf32>
    %13 = math.erf %12 : vector<16x256xf32>
    %cst_8 = arith.constant 1.000000e+00 : f32
    %14 = vector.broadcast %cst_8 : f32 to vector<16x256xf32>
    %15 = arith.addf %14, %13 : vector<16x256xf32>
    %16 = arith.mulf %10, %15 : vector<16x256xf32>
    %c0_9 = arith.constant 0 : index
    %c0_10 = arith.constant 0 : index
    %17 = vector.load %arg8[%c0_9, %c0_10] : memref<16x128xf32, #tpu.memory_space<vmem>>, vector<16x128xf32>
    %18 = arith.truncf %16 : vector<16x256xf32> to vector<16x256xbf16>
    %c0_11 = arith.constant 0 : index
    %c0_12 = arith.constant 0 : index
    %19 = vector.load %arg5[%c0_11, %c0_12] : memref<256x128xbf16, #tpu.memory_space<vmem>>, vector<256x128xbf16>
    %cst_13 = arith.constant dense<0.000000e+00> : vector<16x128xf32>
    %20 = tpu.matmul %18, %19, %cst_13 {dimension_numbers = #tpu.dot_dimension_numbers<[1], [0], [0], [1], [0, 0, 1, 1], [], []>} : vector<16x256xbf16>, vector<256x128xbf16>, vector<16x128xf32> -> vector<16x128xf32>
    %21 = arith.addf %17, %20 : vector<16x128xf32>
    %c0_14 = arith.constant 0 : index
    %c0_15 = arith.constant 0 : index
    %22 = vector.load %arg8[%c0_14, %c0_15] : memref<16x128xf32, #tpu.memory_space<vmem>>, vector<16x128xf32>
    tpu.vector_store %arg8[%c0_14, %c0_15], %21 {strides = array<i32>} : memref<16x128xf32, #tpu.memory_space<vmem>>, vector<16x128xf32>,
    %c0_i32_16 = arith.constant 0 : i32
    %23 = arith.cmpi eq, %arg1, %c0_i32_16 : i32
    %24 = arith.extui %23 : i1 to i32
    %c0_i32_17 = arith.constant 0 : i32
    %25 = arith.cmpi ne, %24, %c0_i32_17 : i32
    scf.if %25 {
      %c0_18 = arith.constant 0 : index
      %c0_19 = arith.constant 0 : index
      %26 = vector.load %arg8[%c0_18, %c0_19] : memref<16x128xf32, #tpu.memory_space<vmem>>, vector<16x128xf32>
      %c0_20 = arith.constant 0 : index
      %c0_21 = arith.constant 0 : index
      %27 = vector.load %arg6[%c0_20, %c0_21] : memref<1x128xf32, #tpu.memory_space<vmem>>, vector<1x128xf32>
      %28 = vector.broadcast %27 : vector<1x128xf32> to vector<16x128xf32>
      %29 = arith.addf %26, %28 : vector<16x128xf32>
      %c0_22 = arith.constant 0 : index
      %c0_23 = arith.constant 0 : index
      %30 = vector.load %arg7[%c0_22, %c0_23] : memref<16x128xf32, #tpu.memory_space<vmem>>, vector<16x128xf32>
      tpu.vector_store %arg7[%c0_22, %c0_23], %29 {strides = array<i32>} : memref<16x128xf32, #tpu.memory_space<vmem>>, vector<16x128xf32>,
    } else {
    }
    return
  }
  func.func @transform_0(%arg0: i32, %arg1: i32) -> (i32, i32) {
    %c0_i32 = arith.constant 0 : i32
    %c0_i32_0 = arith.constant 0 : i32
    return %arg0, %c0_i32 : i32, i32
  }
  func.func @transform_1(%arg0: i32, %arg1: i32) -> (i32, i32) {
    %c0_i32 = arith.constant 0 : i32
    %c0_i32_0 = arith.constant 0 : i32
    return %c0_i32, %arg1 : i32, i32
  }
  func.func @transform_2(%arg0: i32, %arg1: i32) -> (i32, i32) {
    %c0_i32 = arith.constant 0 : i32
    %c0_i32_0 = arith.constant 0 : i32
    return %c0_i32, %arg1 : i32, i32
  }
  func.func @transform_3(%arg0: i32, %arg1: i32) -> (i32, i32) {
    %c0_i32 = arith.constant 0 : i32
    %c0_i32_0 = arith.constant 0 : i32
    return %arg1, %c0_i32 : i32, i32
  }
  func.func @transform_4(%arg0: i32, %arg1: i32) -> (i32, i32) {
    %c0_i32 = arith.constant 0 : i32
    %c0_i32_0 = arith.constant 0 : i32
    %c0_i32_1 = arith.constant 0 : i32
    return %c0_i32, %c0_i32_0 : i32, i32
  }
  func.func @transform_5(%arg0: i32, %arg1: i32) -> (i32, i32) {
    %c0_i32 = arith.constant 0 : i32
    %c0_i32_0 = arith.constant 0 : i32
    return %arg0, %c0_i32 : i32, i32
  }
}

</mosaic_0001>

<bundles_post_ra>
// kernel: tpu_custom_call.1
= control target key start
LH: loop header
LB: loop body
LE: loop exit
PB: predicated region body
PF: predicated region fallthrough
CT: control target
= control target key end

     0   :  { %10 = vsyncpa [#allocation4], 0  ;;  %s722_s0 = inlined_call_operand.hbm [shape: bf16[16,128], index: 0, kind: input, shape index: {}]   ;;  %s723_s1 = inlined_call_operand.hbm [shape: bf16[128,256], index: 1, kind: input, shape index: {}]   ;;  %s724_s2 = inlined_call_operand.vmem [shape: f32[1,256], index: 2, kind: input, shape index: {}]   ;;  %s725_s3 = inlined_call_operand.hbm [shape: bf16[256,128], index: 3, kind: input, shape index: {}]   ;;  %s726_s4 = inlined_call_operand.vmem [shape: f32[1,128], index: 4, kind: input, shape index: {}]   ;;  %s727_s5 = inlined_call_operand.hbm [shape: f32[16,128], index: 5, kind: output, shape index: {}]  }
   0x1   :  { %11 = vsyncpa [#allocation7], 0 }
   0x2   :  { %12 = vsyncpa [#allocation5], 0  ;;  %s659_s18 = smov [#allocation6]  }
   0x3   :  { %s30_s19 = sshll.u32 %s659_s18, 4  ;;  %s31_s19 = int_to_ptr.vmem [resolvable:$true] %s30_s19 }
   0x4   :  { %s581_s20 = scalar_lea.vmem %s31_s19, 2048  ;;  %p586_p1 = scmp.lt.s32.totalorder %s31_s19, %s31_s19 }
   0x5   :  { %p582_p0 = scmp.ne.s32.totalorder %s31_s19, %s581_s20  ;;  %p587_p2 = scmp.lt.s32.totalorder %s581_s20, %s581_s20 }
   0x7   :  { %p588_p3 = por %p587_p2, %p586_p1 }
   0x9   :  { %p589_p4 = pnand %p588_p3, %p582_p0 }
   0xb   :  { %592 = shalt.err (!%p589_p4)
}
   0xc   :  { %s660_s21 = smov 128   ;;  %s661_s22 = smov 8  }
   0xd   :  { %36 = dma.hbm_to_vmem [thread:$0]  %s723_s1, 2048, %s31_s19, [#allocation7], %s660_s21, %s660_s21, %s661_s22  }
   0xe   :  { %s662_s25 = smov [#allocation3]  }
   0xf   :  { %s18_s26 = sshll.u32 %s662_s25, 4  ;;  %s19_s26 = int_to_ptr.vmem [resolvable:$true] %s18_s26 }
  0x10   :  { %s601_s27 = scalar_lea.vmem %s19_s26, 128  ;;  %p606_p6 = scmp.lt.s32.totalorder %s19_s26, %s19_s26 }
  0x11   :  { %p602_p5 = scmp.ne.s32.totalorder %s19_s26, %s601_s27  ;;  %p607_p7 = scmp.lt.s32.totalorder %s601_s27, %s601_s27 }
  0x13   :  { %p608_p8 = por %p607_p7, %p606_p6 }
  0x15   :  { %p609_p9 = pnand %p608_p8, %p602_p5 }
  0x17   :  { %612 = shalt.err (!%p609_p9)
}
  0x18   :  { %s663_s28 = smov 64   ;;  %s664_s29 = smov 4  }
  0x19   :  { %24 = dma.hbm_to_vmem [thread:$0]  %s722_s0, 128, %s19_s26, [#allocation4], %s663_s28, %s663_s28, %s664_s29  }
  0x1a   :  { %s665_s7 = smov [#allocation8]  }
  0x1b   :  { %s44_s8 = sshll.u32 %s665_s7, 4  ;;  %s45_s8 = int_to_ptr.vmem [resolvable:$true] %s44_s8 }
  0x1c   :  { %s621_s1 = scalar_lea.vmem %s45_s8, 2048  ;;  %p626_p11 = scmp.lt.s32.totalorder %s45_s8, %s45_s8 }
  0x1d   :  { %p622_p10 = scmp.ne.s32.totalorder %s45_s8, %s621_s1  ;;  %p627_p12 = scmp.lt.s32.totalorder %s621_s1, %s621_s1 }
  0x1f   :  { %p628_p13 = por %p627_p12, %p626_p11 }
  0x21   :  { %p629_p0 = pnand %p628_p13, %p622_p10 }
  0x23   :  { %632 = shalt.err (!%p629_p0)
}
  0x24   :  { %50 = dma.hbm_to_vmem [thread:$0]  %s725_s3, 2048, %s45_s8, [#allocation7], %s663_s28, %s663_s28, %s664_s29  }
  0x25   :  { %653 = dma.done.wait [#allocation4], 128  }
  0x26   :  { %654 = vsyncadd [#allocation4], 4294967168 }
  0x27   :  { %655 = dma.done.wait [#allocation7], 4096  }
  0x28   :  { %656 = vsyncadd [#allocation7], 4294963200  ;;  %v666_v0 = vmov 0   ;;  %v524_v1 = vld [vmem:[#allocation6 + $0x74] ss:$8 sps:$4 sm:$0xff]   ;;  %v553_v22 = vld [vmem:[#allocation8 + $0x68] sm:$0xff]   ;;  %v89_v34 = vlaneseq }
  0x29   :  { %217 = vmatprep.mubr.bf16.mxu0 %v666_v0  ;;  %v526_v2 = vld [vmem:[#allocation6 + $0x70] ss:$8 sps:$4 sm:$0xff]   ;;  %185 = vmatprep.subr.bf16.mxu0 %v524_v1  ;;  %v527_v3 = vld [vmem:[#allocation6 + $0x64] ss:$8 sps:$4 sm:$0xff]   ;;  %v529_v4 = vld [vmem:[#allocation6 + $0x60] ss:$8 sps:$4 sm:$0xff]  }
  0x2a   :  { %186 = vmatpush1.bf16.msra.mxu0 %v526_v2  ;;  %v530_v5 = vld [vmem:[#allocation6 + $0x54] ss:$8 sps:$4 sm:$0xff]   ;;  %v532_v6 = vld [vmem:[#allocation6 + $0x50] ss:$8 sps:$4 sm:$0xff]   ;;  %v533_v7 = vld [vmem:[#allocation6 + $0x44] ss:$8 sps:$4 sm:$0xff]  }
  0x2b   :  { %187 = vmatprep.subr.bf16.mxu0 %v527_v3  ;;  %v535_v8 = vld [vmem:[#allocation6 + $0x40] ss:$8 sps:$4 sm:$0xff]   ;;  %v536_v9 = vld [vmem:[#allocation6 + $0x34] ss:$8 sps:$4 sm:$0xff]   ;;  %v538_v10 = vld [vmem:[#allocation6 + $0x30] ss:$8 sps:$4 sm:$0xff]  }
  0x2c   :  { %v539_v11 = vld [vmem:[#allocation6 + $0x24] ss:$8 sps:$4 sm:$0xff]   ;;  %v541_v12 = vld [vmem:[#allocation6 + $0x20] ss:$8 sps:$4 sm:$0xff]   ;;  %v542_v13 = vld [vmem:[#allocation6 + $0x14] ss:$8 sps:$4 sm:$0xff]  }
  0x2d   :  { %v544_v14 = vld [vmem:[#allocation6 + $0x10] ss:$8 sps:$4 sm:$0xff]   ;;  %v545_v15 = vld [vmem:[#allocation6 + $0x4] ss:$8 sps:$4 sm:$0xff]   ;;  %v547_v16 = vld [vmem:[#allocation6] ss:$8 sps:$4 sm:$0xff]  }
  0x2e   :  { %188 = vmatpush1.bf16.msra.mxu0 %v529_v4  ;;  %v548_v17 = vld [vmem:[#allocation3] sm:$0xff]   ;;  %v551_v20 = vld [vmem:[#allocation8 + $0x70] sm:$0xff]   ;;  %v554_v23 = vld [vmem:[#allocation8 + $0x28] sm:$0xff]   ;;  %v90_v35 = vshrl.u32 %v89_v34, 7  ;;  %s667_s12 = smov [#allocation9]  }
  0x2f   :  { %189 = vmatprep.subr.bf16.mxu0 %v530_v5  ;;  %v549_v18 = vld [vmem:[#allocation8 + $0x78] sm:$0xff]   ;;  %v552_v21 = vld [vmem:[#allocation8 + $0x30] sm:$0xff]   ;;  %v555_v24 = vld [vmem:[#allocation8 + $0x60] sm:$0xff]   ;;  %s446_s13 = sshll.u32 %s667_s12, 4  ;;  %s447_s13 = int_to_ptr.vmem [resolvable:$true] %s446_s13 }
  0x30   :  { %v550_v19 = vld [vmem:[#allocation8 + $0x38] sm:$0xff]   ;;  %493 = vmatprep.subr.bf16.mxu1 %v549_v18  ;;  %v556_v25 = vld [vmem:[#allocation8 + $0x20] sm:$0xff]   ;;  %v559_v28 = vld [vmem:[#allocation8 + $0x50] sm:$0xff]   ;;  %v91_v36 = vsub.s32 0, %v90_v35  ;;  %v95_v38 = vsub.s32 1, %v90_v35  ;;  %s633_s14 = scalar_lea.vmem %s447_s13, 256  ;;  %p638_p2 = scmp.lt.s32.totalorder %s447_s13, %s447_s13 }
  0x31   :  { %494 = vmatpush3.bf16.msra.mxu1 %v550_v19  ;;  %v557_v26 = vld [vmem:[#allocation8 + $0x58] sm:$0xff]   ;;  %v560_v29 = vld [vmem:[#allocation8 + $0x10] sm:$0xff]   ;;  %v561_v30 = vld [vmem:[#allocation8 + $0x48] sm:$0xff]   ;;  %p634_p1 = scmp.ne.s32.totalorder %s447_s13, %s633_s14  ;;  %p639_p3 = scmp.lt.s32.totalorder %s633_s14, %s633_s14 }
  0x32   :  { %190 = vmatpush1.bf16.msra.mxu0 %v532_v6  ;;  %495 = vmatprep.subr.bf16.mxu1 %v551_v20  ;;  %v558_v27 = vld [vmem:[#allocation8 + $0x18] sm:$0xff]   ;;  %v562_v31 = vld [vmem:[#allocation8 + $0x8] sm:$0xff]   ;;  %v563_v32 = vld [vmem:[#allocation8 + $0x40] sm:$0xff]  }
  0x33   :  { %191 = vmatprep.subr.bf16.mxu0 %v533_v7  ;;  %v564_v33 = vld [vmem:[#allocation8] sm:$0xff]   ;;  %v87_v37 = vld [vmem:[%s724_s2] sm:$0x3]  ;;  %p640_p4 = por %p639_p3, %p638_p2 }
  0x34   :  { %v92_v39 = vrot.slane %v87_v37, %v91_v36  ;;  %v96_v40 = vrot.slane %v87_v37, %v95_v38 }
  0x35   :  { %496 = vmatpush3.bf16.msra.mxu1 %v552_v21  ;;  %p641_p5 = pnand %p640_p4, %p634_p1 }
  0x36   :  { %192 = vmatpush1.bf16.msra.mxu0 %v535_v8  ;;  %497 = vmatprep.subr.bf16.mxu1 %v553_v22 }
  0x37   :  { %193 = vmatprep.subr.bf16.mxu0 %v536_v9  ;;  %v492_v9 = vld [vmem:[%s726_s4] ss:$0 sm:$0xff] }
  0x39   :  { %498 = vmatpush3.bf16.msra.mxu1 %v554_v23 }
  0x3a   :  { %194 = vmatpush1.bf16.msra.mxu0 %v538_v10  ;;  %499 = vmatprep.subr.bf16.mxu1 %v555_v24 }
  0x3b   :  { %195 = vmatprep.subr.bf16.mxu0 %v539_v11 }
  0x3d   :  { %500 = vmatpush3.bf16.msra.mxu1 %v556_v25 }
  0x3e   :  { %196 = vmatpush1.bf16.msra.mxu0 %v541_v12  ;;  %501 = vmatprep.subr.bf16.mxu1 %v557_v26 }
  0x3f   :  { %197 = vmatprep.subr.bf16.mxu0 %v542_v13 }
  0x41   :  { %502 = vmatpush3.bf16.msra.mxu1 %v558_v27 }
  0x42   :  { %198 = vmatpush1.bf16.msra.mxu0 %v544_v14  ;;  %503 = vmatprep.subr.bf16.mxu1 %v559_v28 }
  0x43   :  { %199 = vmatprep.subr.bf16.mxu0 %v545_v15 }
  0x45   :  { %504 = vmatpush3.bf16.msra.mxu1 %v560_v29 }
  0x46   :  { %200 = vmatpush1.bf16.msra.mxu0 %v547_v16  ;;  %505 = vmatprep.subr.bf16.mxu1 %v561_v30 }
  0x49   :  { %218 = vmatmul.mubr.bf16.vlgmr.msra.gmra.mxu0 %v548_v17  ;;  %506 = vmatpush3.bf16.msra.mxu1 %v562_v31 }
  0x4a   :  { %507 = vmatprep.subr.bf16.mxu1 %v563_v32 }
  0x4d   :  { %508 = vmatpush3.bf16.msra.mxu1 %v564_v33 }
 0x109   :  { %v219_v41 = vpop.f32.mrf.mxu0 }
 0x10a   :  { %v220_v42 = vadd.f32 %v219_v41, %v92_v39 }
 0x10b   :  { %v221_v43 = vpop.f32.mrf.mxu0 }
 0x10c   :  { %v222_v44 = vadd.f32 %v221_v43, %v96_v40  ;;  %v232_v45 = vmul.f32 0.70710677, %v220_v42  ;;  %v228_v0 = vmul.f32 0.5, %v220_v42 }
 0x10d   :  { %v223_v46 = vpop.f32.mrf.mxu0 }
 0x10e   :  { %v233_v47 = vmul.f32 0.70710677, %v222_v44  ;;  %v224_v48 = vadd.f32 %v223_v46, %v92_v39  ;;  %v229_v61 = vmul.f32 0.5, %v222_v44 }
 0x10f   :  { %v225_v49 = vpop.f32.mrf.mxu0 }
 0x110   :  { %565 = verf.f32 %v233_v47  ;;  %v234_v50 = vmul.f32 0.70710677, %v224_v48  ;;  %v226_v51 = vadd.f32 %v225_v49, %v96_v40  ;;  %v230_v60 = vmul.f32 0.5, %v224_v48 }
 0x111   :  { %567 = verf.f32 %v232_v45 }
 0x112   :  { %569 = verf.f32 %v234_v50  ;;  %v235_v52 = vmul.f32 0.70710677, %v226_v51  ;;  %v231_v62 = vmul.f32 0.5, %v226_v51 }
 0x114   :  { %571 = verf.f32 %v235_v52 }
 0x11d   :  { %v566_v53 = vpop.eup %565 }
 0x11e   :  { %v568_v54 = vpop.eup %567  ;;  %v241_v57 = vadd.f32 1.0, %v566_v53 }
 0x11f   :  { %v570_v55 = vpop.eup %569  ;;  %v240_v59 = vadd.f32 1.0, %v568_v54 }
 0x120   :  { %v242_v56 = vadd.f32 1.0, %v570_v55  ;;  %v245_v2 = vmul.f32 %v241_v57, %v229_v61 }
 0x121   :  { %v572_v58 = vpop.eup %571  ;;  %v244_v4 = vmul.f32 %v240_v59, %v228_v0 }
 0x122   :  { %v243_v63 = vadd.f32 1.0, %v572_v58  ;;  %v246_v1 = vmul.f32 %v242_v56, %v230_v60 }
 0x124   :  { %v247_v3 = vmul.f32 %v243_v63, %v231_v62  ;;  %v250_v6 = vpack.c.bf16 %v246_v1, %v244_v4 }
 0x126   :  { %v251_v5 = vpack.c.bf16 %v247_v3, %v245_v2 }
 0x128   :  { %412 = vmatprep.mubr.bf16.mxu1 %v251_v5 }
 0x129   :  { %413 = vmatmul.mubr.bf16.vlgmr.msra.gmra.mxu1 %v250_v6 }
 0x1e9   :  { %v509_v7 = vpop.f32.mrf.mxu1 }
 0x1eb   :  { %v510_v8 = vpop.f32.mrf.mxu1 }
 0x1ec   :  { %v511_v10 = vadd.f32 %v510_v8, %v509_v7 }
 0x1ed   :  { %v512_v11 = vpop.f32.mrf.mxu1 }
 0x1ee   :  { %v437_v12 = vadd.f32 %v511_v10, %v492_v9 }
 0x1ef   :  { %v513_v13 = vpop.f32.mrf.mxu1 }
 0x1f0   :  { %439 = vst [vmem:[#allocation9] sm:$0xff] %v437_v12  ;;  %v514_v14 = vadd.f32 %v513_v13, %v512_v11 }
 0x1f2   :  { %v438_v15 = vadd.f32 %v514_v14, %v492_v9 }
 0x1f4   :  { %440 = vst [vmem:[#allocation9 + $0x8] sm:$0xff] %v438_v15 }
 0x1f5   :  { %644 = shalt.err (!%p641_p5)
}
 0x1f6   :  { %452 = dma.vmem_to_hbm [thread:$0]  %s447_s13, 256, %s727_s5, [#allocation5], %s660_s21, %s660_s21, %s661_s22  }
 0x1f7   :  { %657 = dma.done.wait [#allocation5], 256  }
 0x1f8   :  { %658 = vsyncadd [#allocation5], 4294967040 }
 0x1f9   :  { %456 = vsyncpa [#allocation4], 1 }
 0x1fa   :  { %457 = vsyncpa [#allocation7], 1 }
 0x1fb   :  { %458 = vsyncpa [#allocation5], 1 }

</bundles_post_ra>
